<compile_context>
chip_gen: v7x
topology: tpu7x:2x2x1
jax: 0.10.0
libtpu: 0.0.40
codegen_flags: <defaults>
</compile_context>

<pallas_src>
import jax
import jax.numpy as jnp
from jax.experimental import pallas as pl
from jax.experimental.pallas import tpu as pltpu


def _fp_kernel(p1_ref, w0_ref, b0_ref, w1_ref, b1_ref, o_ref):
    """Per-point MLP, channels-first:  relu(W1s @ relu(W0s @ p1 + b0[b]) + b1).

    p1_ref: (D1, Nt) f32     w0_ref: (H0, D1) bf16   b0_ref: (H0, 1) f32
    w1_ref: (H1, H0) bf16    b1_ref: (H1, 1)  f32    o_ref:  (H1, Nt) out dtype
    """
    # In-kernel bf16 cast (VPU, overlapped with the tile DMA) -> f32 HBM reads only.
    x = p1_ref[...].astype(jnp.bfloat16)                              # (D1, Nt)
    h = jnp.dot(w0_ref[...], x, preferred_element_type=jnp.float32)   # (H0, Nt) f32
    h = jnp.maximum(h + b0_ref[...], 0.0)                             # bias0+BN+ReLU
    y = jnp.dot(w1_ref[...], h.astype(w1_ref.dtype),
                preferred_element_type=jnp.float32)                   # (H1, Nt) f32
    y = jnp.maximum(y + b1_ref[...], 0.0)
    o_ref[...] = y.astype(o_ref.dtype)
    # TODO(synk): if a bundle dump ever shows the MXU operand path binding (unlikely
    # at these channel widths), switch to a weight-stationary formulation + XLU
    # transpose of the small (lanes, Cout) result.


def _fold_conv_bn(conv_w, conv_b, gamma, beta, mean, var, eps=1e-5):
    """Fold Conv1d(k=1) bias + eval-mode BatchNorm1d into (scaled W, shift).

    conv_w: [Cout, Cin, 1] -> W_scaled [Cout, Cin], shift [Cout] such that
      BN(conv(x)) == W_scaled @ x + shift[:, None]        (channels-first x)
    """
    w = conv_w[:, :, 0].astype(jnp.float32)                  # [Cout, Cin]
    scale = gamma * jax.lax.rsqrt(var + eps)                 # [Cout]
    w_scaled = w * scale[:, None]
    shift = scale * (conv_b - mean) + beta
    return w_scaled, shift


def _round_up(x, m):
    return ((x + m - 1) // m) * m


def _choose_nt(n_pad, batch, nt_max):
    """Largest 128-multiple divisor of n_pad that is <= nt_max.

    When batch == 1, cap the tile so the grid exposes >= 2 "parallel" blocks
    (keeps both v7x TensorCores busy)."""
    units = n_pad // 128
    divs = [d for d in range(1, units + 1) if units % d == 0]
    cand = [d for d in divs if d * 128 <= nt_max] or [min(divs)]
    nt_units = max(cand)
    if batch == 1 and units // nt_units < 2 and units >= 2:
        nt_units = max(d for d in divs if units // d >= 2)
    return nt_units * 128


def pointnet_fp0_forward(xyz1, xyz2, points1, points2, params, *,
                         nt_max=4096, out_dtype=jnp.float32):
    """
    xyz1: [B, C, N], xyz2: [B, C, S=1], points1: [B, D1, N], points2: [B, D2, S=1]
    returns: [B, mlp1, N]   (same layout as the PyTorch module output)
    """
    B, _, N = xyz1.shape
    S = xyz2.shape[2]
    assert S == 1, "repeat(1, N, 1) + cat is only shape-consistent when S == 1"

    D1 = points1.shape[1]
    D2 = points2.shape[1]

    # ---- fold conv bias + eval-mode BN into scaled weights + shifts (f32) ----
    w0s, shift0 = _fold_conv_bn(params["conv0_w"], params["conv0_b"],
                                params["bn0_g"], params["bn0_b"],
                                params["bn0_m"], params["bn0_v"])    # [H0,Din],[H0]
    w1s, shift1 = _fold_conv_bn(params["conv1_w"], params["conv1_b"],
                                params["bn1_g"], params["bn1_b"],
                                params["bn1_m"], params["bn1_v"])    # [H1,H0],[H1]
    H0, H1 = w0s.shape[0], w1s.shape[0]

    # points2 has S == 1: its conv0 contribution is a per-batch bias (the
    # broadcast+concat is never materialized in HBM).
    w0a = w0s[:, :D1]                                                 # [H0, D1]
    w0b = w0s[:, D1:D1 + D2]                                          # [H0, D2]
    bias0 = (jnp.einsum("hd,bd->bh", w0b,
                        points2[:, :, 0].astype(jnp.float32))
             + shift0[None, :])                                       # [B, H0] f32

    # ---- tiling: large lane-dense N tiles, pad only if N is not 128-aligned ----
    N_pad = _round_up(N, 128)
    Nt = _choose_nt(N_pad, B, nt_max)
    p1 = points1                                                      # [B, D1, N] f32
    if N_pad != N:
        # Fallback for ragged N; padded columns compute relu(bias) and are
        # sliced off below -- do NOT remove the slice while padding exists.
        p1 = jnp.pad(p1, ((0, 0), (0, 0), (0, N_pad - N)))

    w0a_bf = w0a.astype(jnp.bfloat16)                                 # [H0, D1]
    w1_bf = w1s.astype(jnp.bfloat16)                                  # [H1, H0]
    b0 = bias0[:, :, None]                                            # [B, H0, 1] f32
    b1 = shift1[:, None]                                              # [H1, 1]    f32

    grid = (B, N_pad // Nt)
    out_itemsize = jnp.dtype(out_dtype).itemsize
    flops = 2 * B * N_pad * (D1 * H0 + H0 * H1)
    bytes_accessed = (p1.size * 4 + w0a_bf.size * 2 + w1_bf.size * 2
                      + b0.size * 4 + b1.size * 4
                      + B * H1 * N_pad * out_itemsize)

    out = pl.pallas_call(
        _fp_kernel,
        out_shape=jax.ShapeDtypeStruct((B, H1, N_pad), out_dtype),
        grid_spec=pltpu.PrefetchScalarGridSpec(
            num_scalar_prefetch=0,
            grid=grid,
            in_specs=[
                pl.BlockSpec((pl.Squeezed(), D1, Nt), lambda b, n: (b, 0, n)),   # p1 tile
                pl.BlockSpec((H0, D1), lambda b, n: (0, 0)),                     # W0 (resident)
                pl.BlockSpec((pl.Squeezed(), H0, 1), lambda b, n: (b, 0, 0)),    # bias0[b]
                pl.BlockSpec((H1, H0), lambda b, n: (0, 0)),                     # W1 (resident)
                pl.BlockSpec((H1, 1), lambda b, n: (0, 0)),                      # bias1
            ],
            out_specs=pl.BlockSpec((pl.Squeezed(), H1, Nt), lambda b, n: (b, 0, n)),
        ),
        compiler_params=pltpu.CompilerParams(
            dimension_semantics=("parallel", "parallel")),
        cost_estimate=pl.CostEstimate(flops=flops, transcendentals=0,
                                      bytes_accessed=bytes_accessed),
    )(p1, w0a_bf, b0, w1_bf, b1)

    return out[:, :, :N] if N_pad != N else out


def _reference(xyz1, xyz2, points1, points2, params):
    """Pure-JAX f32 reference mirroring the PyTorch forward (eval-mode BN)."""
    B, _, N = xyz1.shape
    p1 = jnp.transpose(points1, (0, 2, 1))
    p2 = jnp.transpose(points2, (0, 2, 1))
    x = jnp.concatenate([p1, jnp.broadcast_to(p2, (B, N, p2.shape[2]))], axis=-1)
    x = jnp.transpose(x, (0, 2, 1))                                  # [B, Din, N]

    def conv_bn_relu(x, cw, cb, g, bt, m, v, eps=1e-5):
        y = jnp.einsum("oc,bcn->bon", cw[:, :, 0], x) + cb[None, :, None]
        y = g[None, :, None] * (y - m[None, :, None]) / jnp.sqrt(v[None, :, None] + eps) \
            + bt[None, :, None]
        return jnp.maximum(y, 0.0)

    y = conv_bn_relu(x, params["conv0_w"], params["conv0_b"],
                     params["bn0_g"], params["bn0_b"], params["bn0_m"], params["bn0_v"])
    y = conv_bn_relu(y, params["conv1_w"], params["conv1_b"],
                     params["bn1_g"], params["bn1_b"], params["bn1_m"], params["bn1_v"])
    return y


if __name__ == "__main__":
    # Shapes consistent with the forward; S must be 1.  N is a 128-multiple so
    # the pad-free / slice-free fast path is exercised.
    B, C, N, S = 2, 3, 2048, 1
    D1, D2 = 16, 16
    in_channel = D1 + D2               # 32
    mlp = (32, 16)

    key = jax.random.PRNGKey(0)
    ks = jax.random.split(key, 12)

    xyz1 = jax.random.normal(ks[0], (B, C, N), jnp.float32)
    xyz2 = jax.random.normal(ks[1], (B, C, S), jnp.float32)
    points1 = jax.random.normal(ks[2], (B, D1, N), jnp.float32)
    points2 = jax.random.normal(ks[3], (B, D2, S), jnp.float32)

    params = {
        # Conv1d(in_channel, mlp[0], 1) / Conv1d(mlp[0], mlp[1], 1)
        "conv0_w": 0.1 * jax.random.normal(ks[4], (mlp[0], in_channel, 1), jnp.float32),
        "conv0_b": 0.1 * jax.random.normal(ks[5], (mlp[0],), jnp.float32),
        "conv1_w": 0.1 * jax.random.normal(ks[6], (mlp[1], mlp[0], 1), jnp.float32),
        "conv1_b": 0.1 * jax.random.normal(ks[7], (mlp[1],), jnp.float32),
        # BatchNorm1d params (deterministic, non-trivial running stats, eval mode)
        "bn0_g": 1.0 + 0.1 * jax.random.normal(ks[8], (mlp[0],), jnp.float32),
        "bn0_b": 0.1 * jax.random.normal(ks[9], (mlp[0],), jnp.float32),
        "bn0_m": 0.05 * jnp.arange(mlp[0], dtype=jnp.float32),
        "bn0_v": 1.0 + 0.01 * jnp.arange(mlp[0], dtype=jnp.float32),
        "bn1_g": 1.0 + 0.1 * jax.random.normal(ks[10], (mlp[1],), jnp.float32),
        "bn1_b": 0.1 * jax.random.normal(ks[11], (mlp[1],), jnp.float32),
        "bn1_m": 0.05 * jnp.arange(mlp[1], dtype=jnp.float32),
        "bn1_v": 1.0 + 0.01 * jnp.arange(mlp[1], dtype=jnp.float32),
    }

    out = pointnet_fp0_forward(xyz1, xyz2, points1, points2, params)
    out = jax.block_until_ready(out)

    ref = _reference(xyz1, xyz2, points1, points2, params)
    assert out.shape == (B, mlp[1], N), out.shape
    # bf16 matmul operands with f32 accumulation vs pure-f32 reference -> looser tol.
    assert jnp.allclose(out, ref, atol=2e-2, rtol=2e-2), \
        float(jnp.max(jnp.abs(out - ref)))

    print("KERNEL_OK")
</pallas_src>

<mosaic_0001>
module attributes {stable_mosaic.version = 11 : i64} {
  func.func @_fp_kernel(%arg0: i32, %arg1: i32, %arg2: memref<1x16x2048xf32, #tpu.memory_space<vmem>>, %arg3: memref<32x16xbf16, #tpu.memory_space<vmem>>, %arg4: memref<1x32x1xf32, #tpu.memory_space<vmem>>, %arg5: memref<16x32xbf16, #tpu.memory_space<vmem>>, %arg6: memref<16x1xf32, #tpu.memory_space<vmem>>, %arg7: memref<1x16x2048xf32, #tpu.memory_space<vmem>>) attributes {dimension_semantics = [#tpu.dimension_semantics<parallel>, #tpu.dimension_semantics<parallel>], iteration_bounds = array<i64: 2, 1>, scalar_prefetch = 0 : i64, scratch_operands = 0 : i64, tpu.core_type = #tpu.core_type<tc>, window_params = [{transform_indices = @transform_0, window_bounds = array<i64: 1, 16, 2048>}, {pipeline_mode = #tpu.pipeline_mode<synchronous>, transform_indices = @transform_1, window_bounds = array<i64: 32, 16>}, {transform_indices = @transform_2, window_bounds = array<i64: 1, 32, 1>}, {pipeline_mode = #tpu.pipeline_mode<synchronous>, transform_indices = @transform_3, window_bounds = array<i64: 16, 32>}, {pipeline_mode = #tpu.pipeline_mode<synchronous>, transform_indices = @transform_4, window_bounds = array<i64: 16, 1>}, {transform_indices = @transform_5, window_bounds = array<i64: 1, 16, 2048>}]} {
    %c0 = arith.constant 0 : index
    %c0_0 = arith.constant 0 : index
    %c0_1 = arith.constant 0 : index
    %0 = vector.load %arg2[%c0, %c0_0, %c0_1] : memref<1x16x2048xf32, #tpu.memory_space<vmem>>, vector<1x16x2048xf32>
    %1 = vector.shape_cast %0 : vector<1x16x2048xf32> to vector<16x2048xf32>
    %2 = arith.truncf %1 : vector<16x2048xf32> to vector<16x2048xbf16>
    %c0_2 = arith.constant 0 : index
    %c0_3 = arith.constant 0 : index
    %3 = vector.load %arg3[%c0_2, %c0_3] : memref<32x16xbf16, #tpu.memory_space<vmem>>, vector<32x16xbf16>
    %cst = arith.constant dense<0.000000e+00> : vector<32x2048xf32>
    %4 = tpu.matmul %3, %2, %cst {dimension_numbers = #tpu.dot_dimension_numbers<[1], [0], [0], [1], [0, 0, 1, 1], [], []>} : vector<32x16xbf16>, vector<16x2048xbf16>, vector<32x2048xf32> -> vector<32x2048xf32>
    %c0_4 = arith.constant 0 : index
    %c0_5 = arith.constant 0 : index
    %c0_6 = arith.constant 0 : index
    %5 = vector.load %arg4[%c0_4, %c0_5, %c0_6] : memref<1x32x1xf32, #tpu.memory_space<vmem>>, vector<1x32x1xf32>
    %6 = vector.shape_cast %5 : vector<1x32x1xf32> to vector<32x1xf32>
    %7 = vector.broadcast %6 : vector<32x1xf32> to vector<32x2048xf32>
    %8 = arith.addf %4, %7 : vector<32x2048xf32>
    %cst_7 = arith.constant 0.000000e+00 : f32
    %9 = vector.broadcast %cst_7 : f32 to vector<32x2048xf32>
    %10 = arith.maximumf %8, %9 : vector<32x2048xf32>
    %c0_8 = arith.constant 0 : index
    %c0_9 = arith.constant 0 : index
    %11 = vector.load %arg5[%c0_8, %c0_9] : memref<16x32xbf16, #tpu.memory_space<vmem>>, vector<16x32xbf16>
    %12 = arith.truncf %10 : vector<32x2048xf32> to vector<32x2048xbf16>
    %cst_10 = arith.constant dense<0.000000e+00> : vector<16x2048xf32>
    %13 = tpu.matmul %11, %12, %cst_10 {dimension_numbers = #tpu.dot_dimension_numbers<[1], [0], [0], [1], [0, 0, 1, 1], [], []>} : vector<16x32xbf16>, vector<32x2048xbf16>, vector<16x2048xf32> -> vector<16x2048xf32>
    %c0_11 = arith.constant 0 : index
    %c0_12 = arith.constant 0 : index
    %14 = vector.load %arg6[%c0_11, %c0_12] : memref<16x1xf32, #tpu.memory_space<vmem>>, vector<16x1xf32>
    %15 = vector.broadcast %14 : vector<16x1xf32> to vector<16x2048xf32>
    %16 = arith.addf %13, %15 : vector<16x2048xf32>
    %cst_13 = arith.constant 0.000000e+00 : f32
    %17 = vector.broadcast %cst_13 : f32 to vector<16x2048xf32>
    %18 = arith.maximumf %16, %17 : vector<16x2048xf32>
    %c0_14 = arith.constant 0 : index
    %c0_15 = arith.constant 0 : index
    %c0_16 = arith.constant 0 : index
    %19 = vector.load %arg7[%c0_14, %c0_15, %c0_16] : memref<1x16x2048xf32, #tpu.memory_space<vmem>>, vector<1x16x2048xf32>
    %20 = vector.shape_cast %19 : vector<1x16x2048xf32> to vector<16x2048xf32>
    %21 = vector.shape_cast %18 : vector<16x2048xf32> to vector<1x16x2048xf32>
    tpu.vector_store %arg7[%c0_14, %c0_15, %c0_16], %21 {strides = array<i32>} : memref<1x16x2048xf32, #tpu.memory_space<vmem>>, vector<1x16x2048xf32>,
    return
  }
  func.func @transform_0(%arg0: i32, %arg1: i32) -> (i32, i32, i32) {
    %c0_i32 = arith.constant 0 : i32
    %c0_i32_0 = arith.constant 0 : i32
    return %arg0, %c0_i32, %arg1 : i32, i32, i32
  }
  func.func @transform_1(%arg0: i32, %arg1: i32) -> (i32, i32) {
    %c0_i32 = arith.constant 0 : i32
    %c0_i32_0 = arith.constant 0 : i32
    %c0_i32_1 = arith.constant 0 : i32
    return %c0_i32, %c0_i32_0 : i32, i32
  }
  func.func @transform_2(%arg0: i32, %arg1: i32) -> (i32, i32, i32) {
    %c0_i32 = arith.constant 0 : i32
    %c0_i32_0 = arith.constant 0 : i32
    %c0_i32_1 = arith.constant 0 : i32
    return %arg0, %c0_i32, %c0_i32_0 : i32, i32, i32
  }
  func.func @transform_3(%arg0: i32, %arg1: i32) -> (i32, i32) {
    %c0_i32 = arith.constant 0 : i32
    %c0_i32_0 = arith.constant 0 : i32
    %c0_i32_1 = arith.constant 0 : i32
    return %c0_i32, %c0_i32_0 : i32, i32
  }
  func.func @transform_4(%arg0: i32, %arg1: i32) -> (i32, i32) {
    %c0_i32 = arith.constant 0 : i32
    %c0_i32_0 = arith.constant 0 : i32
    %c0_i32_1 = arith.constant 0 : i32
    return %c0_i32, %c0_i32_0 : i32, i32
  }
  func.func @transform_5(%arg0: i32, %arg1: i32) -> (i32, i32, i32) {
    %c0_i32 = arith.constant 0 : i32
    %c0_i32_0 = arith.constant 0 : i32
    return %arg0, %c0_i32, %arg1 : i32, i32, i32
  }
}

</mosaic_0001>

<bundles_post_ra>
// kernel: tpu_custom_call.1
= control target key start
LH: loop header
LB: loop body
LE: loop exit
PB: predicated region body
PF: predicated region fallthrough
CT: control target
= control target key end

     0   :  { %10 = vsyncpa [#allocation3], 0  ;;  %s2172_s0 = inlined_call_operand.hbm [shape: f32[2,16,2048], index: 0, kind: input, shape index: {}]   ;;  %s2173_s1 = inlined_call_operand.vmem [shape: bf16[32,16], index: 1, kind: input, shape index: {}]   ;;  %s2174_s2 = inlined_call_operand.vmem [shape: f32[2,32,1], index: 2, kind: input, shape index: {}]   ;;  %s2175_s3 = inlined_call_operand.vmem [shape: bf16[16,32], index: 3, kind: input, shape index: {}]   ;;  %s2176_s4 = inlined_call_operand.vmem [shape: f32[16,1], index: 4, kind: input, shape index: {}]   ;;  %s2177_s5 = inlined_call_operand.hbm [shape: f32[2,16,2048], index: 5, kind: output, shape index: {}]  }
   0x1   :  { %12 = vsyncpa [#allocation3 + $0x1], 0 }
   0x2   :  { %13 = vsyncpa [#allocation4], 0 }
   0x3   :  { %15 = vsyncpa [#allocation4 + $0x1], 0  ;;  %s1713_s18 = smov 0   ;;  %s1715_s19 = smov 0  }
   0x4   :  { %s1717_s20 = smov 0   ;;  %s1719_s21 = smov 0  }
   0x5   :  { %s1721_s22 = smov 0   ;;  %s1723_s23 = smov 0  }
   0x6 LB: > { %s1443_s24 = sadd.s32 4294967295, %s1674_s23   ;;  %s1444_s25 = sadd.s32 4294967294, %s1674_s23   ;;  %s1674_s23 = sphi %s1723_s23, %s21_s23   ;;  %s1670_s22 = sphi %s1721_s22, %s2192_s22   ;;  %s1666_s21 = sphi %s1719_s21, %s2191_s21   ;;  %s1662_s20 = sphi %s1717_s20, %s2190_s20   ;;  %s1658_s19 = sphi %s1715_s19, %s2189_s19   ;;  %s1654_s18 = sphi %s1713_s18, %s2188_s18  }
   0x7   : > { %s33_s26 = sadd.s32 1, %s1670_s22  ;;  %s42_s27 = sadd.s32 1, %s1662_s20 }
   0x8   : > { %p35_p0 = scmp.ge.s32.totalorder %s33_s26, 2  ;;  %p49_p1 = scmp.ne.s32.totalorder %s1662_s20, %s1658_s19 }
   0x9   : > { %p50_p2 = scmp.eq.s32.totalorder %s1674_s23, 0  ;;  %p55_p3 = scmp.ne.s32.totalorder %s1658_s19, %s1654_s18 }
   0xa   : > { %s2194_s26 = smov (%p35_p0, %s33_s26), 0  ;;  %p56_p5 = scmp.eq.s32.totalorder %s1443_s24, 0 }
   0xb   : > { %p1754_p4 = por %p50_p2, %p49_p1  ;;  %s37_s29 = ssub.s32 %s1670_s22, %s2194_s26 }
   0xc   : > { %p170_p6 = scmp.eq.s32.totalorder %s1443_s24, 1  ;;  %p40_p7 = scmp.eq.s32.totalorder %s37_s29, 0 }
   0xd   : > { %p1760_p8 = por %p56_p5, %p55_p3  ;;  %p176_p10 = scmp.eq.s32.totalorder %s1444_s25, 1 }
   0xe   : > { %p1764_p9 = por %p170_p6, %p49_p1  ;;  %p1502_p13 = scmp.lt.s32.totalorder %s1674_s23, 2 }
   0xf   : > { %s1769_s7 = scalar_select %p40_p7, %s1662_s20, %s42_s27  }
  0x10   : > { %s2181_s6 = scalar_select %p1764_p9, 1, 0 }
  0x11   : > { %p1771_p11 = por %p176_p10, %p55_p3  ;;  %s205_s9 = sand.u32 1, %s1662_s20  }
  0x12   : > { %s1447_s10 = sshll.u32 %s205_s9, 8  ;;  %s1487_s11 = sshll.u32 %s1670_s22, 12 }
  0x13   : > { %s2182_s8 = scalar_select %p1771_p11, 1, 0 }
  0x14   : > { %s1782_s14 = scalar_lea.hbm %s2172_s0, %s1487_s11  ;;  %s209_s15 = scalar_lea.vmem [#allocation2], %s1447_s10 }
  0x15   : > { %s218_s16 = sshll.u32 %s209_s15, 4  ;;  %p1788_p0 = pnand %p1502_p13, %p1754_p4  ;;  %s1784_s16 = int_to_ptr.vmem [resolvable:$true] %s218_s16 }
  0x16   : > { %s1793_s24 = scalar_lea.sflag [#allocation3], %s205_s9  ;;  %s1562_s25 = scalar_lea.hbm %s1782_s14, 4096 }
  0x17   : > { %p1563_p2 = scmp.ne.s32.totalorder %s1782_s14, %s1562_s25  ;;  %p1564_p3 = pneg %p1788_p0 }
  0x18   : > { %s1567_s28 = scalar_lea.hbm %s2172_s0, 8192  ;;  %p1568_p4 = scmp.lt.u32.totalorder %s1782_s14, %s2172_s0 }
  0x19   : > { %p1565_p5 = pnand %p1564_p3, %p1563_p2  ;;  %p1569_p7 = scmp.lt.u32.totalorder %s1567_s28, %s1562_s25 }
  0x1a   : > { %p1571_p13 = scmp.lt.u32.totalorder %s1562_s25, %s1782_s14 }
  0x1b   : > { %p1566_p6 = pneg %p1565_p5  ;;  %p1570_p10 = por %p1569_p7, %p1568_p4 }
  0x1d   : > { %p1572_p12 = por %p1571_p13, %p1570_p10 }
  0x1f   : > { %p1573_p1 = pnand %p1572_p12, %p1566_p6 }
  0x21   : > { %1576 = shalt.err (!%p1573_p1)
}
  0x22   : > { %s1577_s9 = scalar_lea.vmem %s1784_s16, 4096  ;;  %s1676_s12 = smov [#allocation2]  }
  0x23   : > { %p1578_p2 = scmp.ne.s32.totalorder %s1784_s16, %s1577_s9  ;;  %s1582_s13 = sshll.u32 %s1676_s12, 4  ;;  %s1583_s13 = int_to_ptr.vmem [resolvable:$false] %s1582_s13 }
  0x24   : > { %s1584_s15 = scalar_lea.vmem %s1583_s13, 8192  ;;  %p1585_p9 = scmp.lt.s32.totalorder %s1784_s16, %s1583_s13 }
  0x25   : > { %p1580_p5 = pnand %p1578_p2, %p1564_p3  ;;  %p1586_p4 = scmp.lt.s32.totalorder %s1584_s15, %s1577_s9 }
  0x27   : > { %p1581_p11 = pneg %p1580_p5  ;;  %p1587_p7 = por %p1586_p4, %p1585_p9 }
  0x29   : > { %p1588_p10 = pnand %p1587_p7, %p1581_p11 }
  0x2b   : > { %1591 = shalt.err (!%p1588_p10)
}
  0x2c   : > { %s1677_s25 = smov 2048   ;;  %s1678_s27 = smov 128  }
  0x2d   : > { %1497 = dma.hbm_to_vmem [thread:$0]  (!%p1788_p0), %s1782_s14, 4096, %s1784_s16, %s1793_s24, %s1677_s25, %s1677_s25, %s1678_s27  }
  0x2e   : > { %p234_p12 = scmp.lt.s32.totalorder %s1674_s23, 3  ;;  %p2184_p1 = scmp.ge.s32.totalorder %s1674_s23, 1 }
  0x30   : > { %p235_p3 = pnand %p2184_p1, %p234_p12 }
  0x31   : > { %s1825_s29 = sand.u32 (!%p235_p3), 1, %s1658_s19  }
  0x32   : > { %238 = sbr.rel (%p235_p3) target bundleno = 582 (0x246), region = 40  ;;  %s1451_s28 = sshll.u32 (!%p235_p3), %s1825_s29, 8 }
  0x33   : > { %s241_s10 = scalar_lea.sflag (!%p235_p3), [#allocation3], %s1825_s29  ;;  %s1831_s11 = scalar_lea.vmem (!%p235_p3), [#allocation2], %s1451_s28 }
  0x39   : > { %1645 = dma.done.wait (%p1760_p8), %s241_s10, 4096  }
  0x3a   : > { %1647 = vsyncadd (%p1760_p8), %s241_s10, 4294963200  ;;  %v1679_v0 = vmov 0   ;;  %p277_p8 = scmp.lt.s32.totalorder %s1666_s21, 1  ;;  %v285_v1 = vld [vmem:[%s1831_s11 + $0x8] sm:$0xff]  ;;  %v287_v3 = vld [vmem:[%s1831_s11 + $0x18] sm:$0xff]  ;;  %vm370_vm0 = vcmask 130048  }
  0x3b   : > { %409 = vmatprep.mubr.bf16.mxu0 %v1679_v0  ;;  %462 = vmatprep.mubr.bf16.mxu1 %v1679_v0  ;;  %v301_v2 = vld [vmem:[%s1831_s11 + $0x88] sm:$0xff]  ;;  %v303_v5 = vld [vmem:[%s1831_s11 + $0x98] sm:$0xff]  ;;  %v284_v6 = vld [vmem:[%s1831_s11] sm:$0xff]  ;;  %vm916_vm1 = vcmask 261120   ;;  %s2057_s16 = scalar_lea.vmem [#allocation5], %s1451_s28  ;;  %s1489_s28 = sshll.u32 %s1666_s21, 12 }
  0x3c   : > { %1557 = vset.pattern.permute.xlu0 %v1679_v0  ;;  %1558 = vset.pattern.permute.xlu1 %v1679_v0  ;;  %v317_v4 = vpack.c.bf16 %v301_v2, %v285_v1  ;;  %v300_v7 = vld [vmem:[%s1831_s11 + $0x80] sm:$0xff]  ;;  %v319_v8 = vpack.c.bf16 %v303_v5, %v287_v3  ;;  %v286_v10 = vld [vmem:[%s1831_s11 + $0x10] sm:$0xff]  ;;  %s1851_s30 = scalar_select %p277_p8, %s1666_s21, 1  ;;  %v289_v14 = vld [vmem:[%s1831_s11 + $0x28] sm:$0xff] }
  0x3d   : > { %v316_v9 = vpack.c.bf16 %v300_v7, %v284_v6  ;;  %v302_v11 = vld [vmem:[%s1831_s11 + $0x90] sm:$0xff]  ;;  %v1856_v13 = vld [vmem:[%s2173_s1] sm:$0xff]   ;;  %v305_v15 = vld [vmem:[%s1831_s11 + $0xa8] sm:$0xff]  ;;  %s2116_s9 = scalar_lea.hbm %s2177_s5, %s1489_s28  ;;  %p2185_p11 = scmp.ne.s32.totalorder %s2181_s6, 0 }
  0x3e   : > { %377 = vmatprep.subr.bf16.mxu0 %v317_v4  ;;  %v318_v12 = vpack.c.bf16 %v302_v11, %v286_v10  ;;  %430 = vmatprep.subr.bf16.mxu1 %v319_v8  ;;  %v291_v16 = vld [vmem:[%s1831_s11 + $0x38] sm:$0xff]  ;;  %v321_v18 = vpack.c.bf16 %v305_v15, %v289_v14  ;;  %v288_v20 = vld [vmem:[%s1831_s11 + $0x20] sm:$0xff]  ;;  %v290_v22 = vld [vmem:[%s1831_s11 + $0x30] sm:$0xff]  ;;  %s1488_s17 = sshll.u32 %s1851_s30, 5  ;;  %s1680_s15 = smov [#allocation5]  }
  0x3f   : > { %378 = vmatpush1.bf16.msra.mxu0 %v316_v9  ;;  %v307_v17 = vld [vmem:[%s1831_s11 + $0xb8] sm:$0xff]  ;;  %v304_v21 = vld [vmem:[%s1831_s11 + $0xa0] sm:$0xff]  ;;  %v306_v24 = vld [vmem:[%s1831_s11 + $0xb0] sm:$0xff]  ;;  %s281_s12 = scalar_lea.vmem %s2174_s2, %s1488_s17  ;;  %s1344_s17 = sshll.u32 %s2057_s16, 4  ;;  %s2118_s17 = int_to_ptr.vmem [resolvable:$true] %s1344_s17 }
  0x40   : > { %431 = vmatpush1.bf16.msra.mxu1 %v318_v12  ;;  %v323_v19 = vpack.c.bf16 %v307_v17, %v291_v16  ;;  %v320_v23 = vpack.c.bf16 %v304_v21, %v288_v20  ;;  %483 = vmatprep.subr.bf16.mxu0 %v321_v18  ;;  %v322_v25 = vpack.c.bf16 %v306_v24, %v290_v22  ;;  %v293_v26 = vld [vmem:[%s1831_s11 + $0x48] sm:$0xff]  ;;  %v295_v29 = vld [vmem:[%s1831_s11 + $0x58] sm:$0xff]  ;;  %v336_v33 = vld [vmem:[%s281_s12] sm:$0xff]  ;;  %s1592_s13 = scalar_lea.vmem %s2118_s17, 4096  ;;  %s1596_s25 = sshll.u32 %s1680_s15, 4  ;;  %s1597_s25 = int_to_ptr.vmem [resolvable:$false] %s1596_s25 }
  0x41   : > { %v309_v27 = vld [vmem:[%s1831_s11 + $0xc8] sm:$0xff]  ;;  %v311_v30 = vld [vmem:[%s1831_s11 + $0xd8] sm:$0xff]  ;;  %342 = vperm.xlu0 %1557, %v336_v33   ;;  %v338_v34 = vld [vmem:[%s281_s12 + $0x10] sm:$0xff]  ;;  %p1593_p9 = scmp.ne.s32.totalorder %s2118_s17, %s1592_s13  ;;  %s1598_s27 = scalar_lea.vmem %s1597_s25, 8192 }
  0x42   : > { %1457 = vmatmul.mubr.msk.bf16.vlgmr.msra.gmra.mrb[0].mxu0 %vm370_vm0, %v1856_v13  ;;  %536 = vmatprep.subr.bf16.mxu1 %v323_v19  ;;  %v325_v28 = vpack.c.bf16 %v309_v27, %v293_v26  ;;  %v327_v31 = vpack.c.bf16 %v311_v30, %v295_v29  ;;  %v1883_v32 = vld [vmem:[%s2173_s1 + $0x8] sm:$0xff]   ;;  %v339_v36 = vld [vmem:[%s281_s12 + $0x18] sm:$0xff]  ;;  %v292_v37 = vld [vmem:[%s1831_s11 + $0x40] sm:$0xff]  ;;  %p1599_p13 = scmp.lt.s32.totalorder %s2118_s17, %s1597_s25  ;;  %p1600_p2 = scmp.lt.s32.totalorder %s1598_s27, %s1592_s13 }
  0x43   : > { %1459 = vmatmul.mubr.msk.bf16.vlgmr.msra.gmra.mrb[0].mxu1 %vm370_vm0, %v1856_v13  ;;  %484 = vmatpush1.bf16.msra.mxu0 %v320_v23  ;;  %v337_v35 = vld [vmem:[%s281_s12 + $0x8] sm:$0xff]  ;;  %v308_v38 = vld [vmem:[%s1831_s11 + $0xc0] sm:$0xff]  ;;  %v294_v39 = vld [vmem:[%s1831_s11 + $0x50] sm:$0xff]  ;;  %s1329_s12 = scalar_lea.sflag [#allocation4], %s1825_s29  ;;  %p1594_p0 = pnand %p1593_p9, %p2185_p11 }
  0x44   : > { %537 = vmatpush1.bf16.msra.mxu1 %v322_v25  ;;  %419 = vmatprep.mubr.bf16.mxu0 %v1679_v0  ;;  %v310_v40 = vld [vmem:[%s1831_s11 + $0xd0] sm:$0xff]  ;;  %v899_v41 = vld [vmem:[%s2176_s4] sm:$0xff]  ;;  %v297_v42 = vld [vmem:[%s1831_s11 + $0x68] sm:$0xff]  ;;  %v324_v45 = vpack.c.bf16 %v308_v38, %v292_v37  ;;  %p1601_p5 = por %p1600_p2, %p1599_p13 }
  0x45   : > { %472 = vmatprep.mubr.bf16.mxu1 %v1679_v0  ;;  %589 = vmatprep.subr.bf16.mxu0 %v325_v28  ;;  %v313_v43 = vld [vmem:[%s1831_s11 + $0xe8] sm:$0xff]  ;;  %v299_v46 = vld [vmem:[%s1831_s11 + $0x78] sm:$0xff]  ;;  %v326_v48 = vpack.c.bf16 %v310_v40, %v294_v39  ;;  %v296_v51 = vld [vmem:[%s1831_s11 + $0x60] sm:$0xff]  ;;  %p1595_p6 = pneg %p1594_p0 }
  0x46   : > { %642 = vmatprep.subr.bf16.mxu1 %v327_v31  ;;  %352 = vperm.xlu1 %1558, %v338_v34   ;;  %v900_v44 = vld [vmem:[%s2176_s4 + $0x8] sm:$0xff]  ;;  %v315_v47 = vld [vmem:[%s1831_s11 + $0xf8] sm:$0xff]  ;;  %v329_v49 = vpack.c.bf16 %v313_v43, %v297_v42  ;;  %v312_v52 = vld [vmem:[%s1831_s11 + $0xe0] sm:$0xff] }
  0x47   : > { %347 = vperm.xlu0 %1557, %v337_v35   ;;  %v331_v50 = vpack.c.bf16 %v315_v47, %v299_v46  ;;  %v298_v53 = vld [vmem:[%s1831_s11 + $0x70] sm:$0xff]  ;;  %v328_v55 = vpack.c.bf16 %v312_v52, %v296_v51  ;;  %p1602_p4 = pnand %p1601_p5, %p1595_p6 }
  0x48   : > { %v314_v54 = vld [vmem:[%s1831_s11 + $0xf0] sm:$0xff] }
  0x49   : > { %v330_v56 = vpack.c.bf16 %v314_v54, %v298_v53 }
  0x4a   : > { %1458 = vmatmul.mubr.msk.bf16.gmra.mrb[4].mxu0 %vm370_vm0, %v1883_v32  ;;  %357 = vperm.xlu1 %1558, %v339_v36  }
  0x4b   : > { %1460 = vmatmul.mubr.msk.bf16.gmra.mrb[4].mxu1 %vm370_vm0, %v1883_v32  ;;  %515 = vmatprep.mubr.bf16.mxu0 %v1679_v0 }
  0x4c   : > { %568 = vmatprep.mubr.bf16.mxu1 %v1679_v0  ;;  %903 = vperm.xlu0 %1557, %v899_v41  }
  0x4e   : > { %908 = vperm.xlu1 %1558, %v900_v44  }
  0x52   : > { %1461 = vmatmul.mubr.msk.bf16.vlgmr.msra.gmra.mrb[8].mxu0 %vm370_vm0, %v1856_v13 }
  0x53   : > { %1463 = vmatmul.mubr.msk.bf16.vlgmr.msra.gmra.mrb[8].mxu1 %vm370_vm0, %v1856_v13  ;;  %590 = vmatpush1.bf16.msra.mxu0 %v324_v45 }
  0x54   : > { %643 = vmatpush1.bf16.msra.mxu1 %v326_v48  ;;  %525 = vmatprep.mubr.bf16.mxu0 %v1679_v0 }
  0x55   : > { %578 = vmatprep.mubr.bf16.mxu1 %v1679_v0  ;;  %695 = vmatprep.subr.bf16.mxu0 %v329_v49 }
  0x56   : > { %748 = vmatprep.subr.bf16.mxu1 %v331_v50 }
  0x5a   : > { %1462 = vmatmul.mubr.msk.bf16.gmra.mrb[12].mxu0 %vm370_vm0, %v1883_v32 }
  0x5b   : > { %1464 = vmatmul.mubr.msk.bf16.gmra.mrb[12].mxu1 %vm370_vm0, %v1883_v32  ;;  %621 = vmatprep.mubr.bf16.mxu0 %v1679_v0 }
  0x5c   : > { %674 = vmatprep.mubr.bf16.mxu1 %v1679_v0 }
  0x62   : > { %1465 = vmatmul.mubr.msk.bf16.vlgmr.msra.gmra.mrb[16].mxu0 %vm370_vm0, %v1856_v13 }
  0x63   : > { %1467 = vmatmul.mubr.msk.bf16.vlgmr.msra.gmra.mrb[16].mxu1 %vm370_vm0, %v1856_v13  ;;  %696 = vmatpush1.bf16.msra.mxu0 %v328_v55 }
  0x64   : > { %749 = vmatpush1.bf16.msra.mxu1 %v330_v56  ;;  %631 = vmatprep.mubr.bf16.mxu0 %v1679_v0 }
  0x65   : > { %684 = vmatprep.mubr.bf16.mxu1 %v1679_v0 }
  0x6a   : > { %1466 = vmatmul.mubr.msk.bf16.gmra.mrb[20].mxu0 %vm370_vm0, %v1883_v32 }
  0x6b   : > { %1468 = vmatmul.mubr.msk.bf16.gmra.mrb[20].mxu1 %vm370_vm0, %v1883_v32  ;;  %727 = vmatprep.mubr.bf16.mxu0 %v1679_v0 }
  0x6c   : > { %780 = vmatprep.mubr.bf16.mxu1 %v1679_v0 }
  0x72   : > { %1469 = vmatmul.mubr.msk.bf16.vlgmr.msra.gmra.mrb[24].mxu0 %vm370_vm0, %v1856_v13 }
  0x73   : > { %1471 = vmatmul.mubr.msk.bf16.vlgmr.msra.gmra.mrb[24].mxu1 %vm370_vm0, %v1856_v13  ;;  %737 = vmatprep.mubr.bf16.mxu0 %v1679_v0 }
  0x74   : > { %790 = vmatprep.mubr.bf16.mxu1 %v1679_v0 }
  0x7a   : > { %1470 = vmatmul.mubr.msk.bf16.gmra.mrb[28].mxu0 %vm370_vm0, %v1883_v32 }
  0x7b   : > { %1472 = vmatmul.mubr.msk.bf16.gmra.mrb[28].mxu1 %vm370_vm0, %v1883_v32  ;;  %952 = vmatprep.mubr.bf16.mxu0 %v1679_v0 }
  0x7c   : > { %995 = vmatprep.mubr.bf16.mxu1 %v1679_v0 }
  0xc0   : > { %v1945_v57 = vpop.permute.xlu0 %342 }
  0xc5   : > { %v1947_v58 = vpop.permute.xlu1 %352 }
  0xc6   : > { %v1949_v60 = vpop.permute.xlu0 %347 }
  0xc9   : > { %v1959_v25 = vpop.permute.xlu1 %357 }
 0x115   : > { %v411_v59 = vpop.f32.mrb[0].mxu0 }
 0x116   : > { %v412_v61 = vadd.f32 %v411_v59, %v1945_v57  ;;  %v464_v62 = vpop.f32.mrb[0].mxu1  ;;  %v413_v63 = vpop.f32.mrb[1].mxu0 }
 0x117   : > { %v465_v1 = vadd.f32 %v464_v62, %v1945_v57  ;;  %v414_v2 = vadd.f32 %v413_v63, %v1945_v57  ;;  %v466_v3 = vpop.f32.mrb[1].mxu1  ;;  %v415_v4 = vpop.f32.mrb[2].mxu0 }
 0x118   : > { %v467_v5 = vadd.f32 %v466_v3, %v1945_v57  ;;  %v416_v6 = vadd.f32 %v415_v4, %v1949_v60  ;;  %v468_v7 = vpop.f32.mrb[2].mxu1  ;;  %v417_v8 = vpop.f32.mrb[3].mxu0  ;;  %v801_v12 = vmax.f32 %v412_v61, 0.0 }
 0x119   : > { %v469_v9 = vadd.f32 %v468_v7, %v1949_v60  ;;  %v418_v10 = vadd.f32 %v417_v8, %v1949_v60  ;;  %v470_v11 = vpop.f32.mrb[3].mxu1  ;;  %v803_v15 = vmax.f32 %v465_v1, 0.0  ;;  %v802_v16 = vmax.f32 %v414_v2, 0.0  ;;  %v1975_v2 = vld [vmem:[%s2175_s3] sm:$0xff]  }
 0x11a   : > { %v817_v13 = vmax.f32 %v416_v6, 0.0  ;;  %v471_v14 = vadd.f32 %v470_v11, %v1949_v60  ;;  %v804_v19 = vmax.f32 %v467_v5, 0.0 }
 0x11b   : > { %v819_v17 = vmax.f32 %v469_v9, 0.0  ;;  %v818_v18 = vmax.f32 %v418_v10, 0.0 }
 0x11c   : > { %v867_v20 = vpack.c.bf16 %v817_v13, %v801_v12  ;;  %v820_v21 = vmax.f32 %v471_v14, 0.0 }
 0x11d   : > { %v869_v22 = vpack.c.bf16 %v819_v17, %v803_v15  ;;  %v868_v23 = vpack.c.bf16 %v818_v18, %v802_v16  ;;  %v421_v24 = vpop.f32.mrb[4].mxu0 }
 0x11e   : > { %v870_v26 = vpack.c.bf16 %v820_v21, %v804_v19  ;;  %v422_v27 = vadd.f32 %v421_v24, %v1947_v58  ;;  %v474_v28 = vpop.f32.mrb[4].mxu1  ;;  %v423_v29 = vpop.f32.mrb[5].mxu0 }
 0x11f   : > { %v475_v30 = vadd.f32 %v474_v28, %v1947_v58  ;;  %v424_v31 = vadd.f32 %v423_v29, %v1947_v58  ;;  %v476_v32 = vpop.f32.mrb[5].mxu1  ;;  %v425_v33 = vpop.f32.mrb[6].mxu0  ;;  %920 = vmatprep.subr.bf16.mxu0 %v868_v23 }
 0x120   : > { %v477_v34 = vadd.f32 %v476_v32, %v1947_v58  ;;  %v426_v35 = vadd.f32 %v425_v33, %v1959_v25  ;;  %v478_v36 = vpop.f32.mrb[6].mxu1  ;;  %963 = vmatprep.subr.bf16.mxu1 %v870_v26  ;;  %v427_v37 = vpop.f32.mrb[7].mxu0  ;;  %921 = vmatpush1.bf16.msra.mxu0 %v867_v20  ;;  %v833_v41 = vmax.f32 %v422_v27, 0.0 }
 0x121   : > { %v479_v38 = vadd.f32 %v478_v36, %v1959_v25  ;;  %v428_v39 = vadd.f32 %v427_v37, %v1959_v25  ;;  %v480_v40 = vpop.f32.mrb[7].mxu1  ;;  %964 = vmatpush1.bf16.msra.mxu1 %v869_v22  ;;  %v835_v44 = vmax.f32 %v475_v30, 0.0  ;;  %v834_v45 = vmax.f32 %v424_v31, 0.0 }
 0x122   : > { %v849_v42 = vmax.f32 %v426_v35, 0.0  ;;  %v481_v43 = vadd.f32 %v480_v40, %v1959_v25  ;;  %v836_v48 = vmax.f32 %v477_v34, 0.0 }
 0x123   : > { %v851_v46 = vmax.f32 %v479_v38, 0.0  ;;  %v850_v47 = vmax.f32 %v428_v39, 0.0 }
 0x124   : > { %v883_v49 = vpack.c.bf16 %v849_v42, %v833_v41  ;;  %v852_v50 = vmax.f32 %v481_v43, 0.0 }
 0x125   : > { %v885_v51 = vpack.c.bf16 %v851_v46, %v835_v44  ;;  %v884_v52 = vpack.c.bf16 %v850_v47, %v834_v45  ;;  %v517_v53 = vpop.f32.mrb[8].mxu0 }
 0x126   : > { %v886_v54 = vpack.c.bf16 %v852_v50, %v836_v48  ;;  %v518_v55 = vadd.f32 %v517_v53, %v1945_v57  ;;  %v570_v56 = vpop.f32.mrb[8].mxu1  ;;  %v519_v59 = vpop.f32.mrb[9].mxu0 }
 0x127   : > { %v571_v61 = vadd.f32 %v570_v56, %v1945_v57  ;;  %v520_v62 = vadd.f32 %v519_v59, %v1945_v57  ;;  %v572_v63 = vpop.f32.mrb[9].mxu1  ;;  %v521_v1 = vpop.f32.mrb[10].mxu0  ;;  %922 = vmatprep.subr.bf16.mxu0 %v884_v52 }
 0x128   : > { %v573_v3 = vadd.f32 %v572_v63, %v1945_v57  ;;  %v522_v4 = vadd.f32 %v521_v1, %v1949_v60  ;;  %v574_v5 = vpop.f32.mrb[10].mxu1  ;;  %965 = vmatprep.subr.bf16.mxu1 %v886_v54  ;;  %v523_v6 = vpop.f32.mrb[11].mxu0  ;;  %923 = vmatpush1.bf16.msra.mxu0 %v883_v49  ;;  %v805_v10 = vmax.f32 %v518_v55, 0.0 }
 0x129   : > { %v575_v7 = vadd.f32 %v574_v5, %v1949_v60  ;;  %v524_v8 = vadd.f32 %v523_v6, %v1949_v60  ;;  %v576_v9 = vpop.f32.mrb[11].mxu1  ;;  %966 = vmatpush1.bf16.msra.mxu1 %v885_v51  ;;  %v807_v13 = vmax.f32 %v571_v61, 0.0  ;;  %v806_v14 = vmax.f32 %v520_v62, 0.0 }
 0x12a   : > { %v821_v11 = vmax.f32 %v522_v4, 0.0  ;;  %v577_v12 = vadd.f32 %v576_v9, %v1949_v60  ;;  %v808_v17 = vmax.f32 %v573_v3, 0.0 }
 0x12b   : > { %v823_v15 = vmax.f32 %v575_v7, 0.0  ;;  %v822_v16 = vmax.f32 %v524_v8, 0.0  ;;  %1474 = vmatmul.mubr.msk.bf16.vlgmr.msra.gmra.mrb[32].mxu0 %vm916_vm1, %v1975_v2 }
 0x12c   : > { %v871_v18 = vpack.c.bf16 %v821_v11, %v805_v10  ;;  %v824_v19 = vmax.f32 %v577_v12, 0.0  ;;  %1475 = vmatmul.mubr.msk.bf16.vlgmr.msra.gmra.mrb[32].mxu1 %vm916_vm1, %v1975_v2  ;;  %1038 = vmatprep.mubr.bf16.mxu0 %v1679_v0 }
 0x12d   : > { %v873_v20 = vpack.c.bf16 %v823_v15, %v807_v13  ;;  %v872_v21 = vpack.c.bf16 %v822_v16, %v806_v14  ;;  %v527_v22 = vpop.f32.mrb[12].mxu0  ;;  %1081 = vmatprep.mubr.bf16.mxu1 %v1679_v0 }
 0x12e   : > { %v874_v23 = vpack.c.bf16 %v824_v19, %v808_v17  ;;  %v528_v24 = vadd.f32 %v527_v22, %v1947_v58  ;;  %v580_v26 = vpop.f32.mrb[12].mxu1  ;;  %v529_v27 = vpop.f32.mrb[13].mxu0 }
 0x12f   : > { %v581_v28 = vadd.f32 %v580_v26, %v1947_v58  ;;  %v530_v29 = vadd.f32 %v529_v27, %v1947_v58  ;;  %v582_v30 = vpop.f32.mrb[13].mxu1  ;;  %v531_v31 = vpop.f32.mrb[14].mxu0  ;;  %1006 = vmatprep.subr.bf16.mxu0 %v872_v21 }
 0x130   : > { %v583_v32 = vadd.f32 %v582_v30, %v1947_v58  ;;  %v532_v33 = vadd.f32 %v531_v31, %v1959_v25  ;;  %v584_v34 = vpop.f32.mrb[14].mxu1  ;;  %1049 = vmatprep.subr.bf16.mxu1 %v874_v23  ;;  %v533_v35 = vpop.f32.mrb[15].mxu0  ;;  %1007 = vmatpush1.bf16.msra.mxu0 %v871_v18  ;;  %v837_v39 = vmax.f32 %v528_v24, 0.0 }
 0x131   : > { %v585_v36 = vadd.f32 %v584_v34, %v1959_v25  ;;  %v534_v37 = vadd.f32 %v533_v35, %v1959_v25  ;;  %v586_v38 = vpop.f32.mrb[15].mxu1  ;;  %1050 = vmatpush1.bf16.msra.mxu1 %v873_v20  ;;  %v839_v42 = vmax.f32 %v581_v28, 0.0  ;;  %v838_v43 = vmax.f32 %v530_v29, 0.0 }
 0x132   : > { %v853_v40 = vmax.f32 %v532_v33, 0.0  ;;  %v587_v41 = vadd.f32 %v586_v38, %v1959_v25  ;;  %v840_v46 = vmax.f32 %v583_v32, 0.0 }
 0x133   : > { %v855_v44 = vmax.f32 %v585_v36, 0.0  ;;  %v854_v45 = vmax.f32 %v534_v37, 0.0 }
 0x134   : > { %v887_v47 = vpack.c.bf16 %v853_v40, %v837_v39  ;;  %v856_v48 = vmax.f32 %v587_v41, 0.0 }
 0x135   : > { %v889_v49 = vpack.c.bf16 %v855_v44, %v839_v42  ;;  %v888_v50 = vpack.c.bf16 %v854_v45, %v838_v43  ;;  %v623_v51 = vpop.f32.mrb[16].mxu0 }
 0x136   : > { %v890_v52 = vpack.c.bf16 %v856_v48, %v840_v46  ;;  %v624_v53 = vadd.f32 %v623_v51, %v1945_v57  ;;  %v676_v54 = vpop.f32.mrb[16].mxu1  ;;  %v625_v55 = vpop.f32.mrb[17].mxu0 }
 0x137   : > { %v677_v56 = vadd.f32 %v676_v54, %v1945_v57  ;;  %v626_v59 = vadd.f32 %v625_v55, %v1945_v57  ;;  %v678_v61 = vpop.f32.mrb[17].mxu1  ;;  %v627_v62 = vpop.f32.mrb[18].mxu0  ;;  %1008 = vmatprep.subr.bf16.mxu0 %v888_v50 }
 0x138   : > { %v679_v63 = vadd.f32 %v678_v61, %v1945_v57  ;;  %v628_v1 = vadd.f32 %v627_v62, %v1949_v60  ;;  %v680_v3 = vpop.f32.mrb[18].mxu1  ;;  %1051 = vmatprep.subr.bf16.mxu1 %v890_v52  ;;  %v629_v4 = vpop.f32.mrb[19].mxu0  ;;  %1009 = vmatpush1.bf16.msra.mxu0 %v887_v47  ;;  %v809_v8 = vmax.f32 %v624_v53, 0.0 }
 0x139   : > { %v681_v5 = vadd.f32 %v680_v3, %v1949_v60  ;;  %v630_v6 = vadd.f32 %v629_v4, %v1949_v60  ;;  %v682_v7 = vpop.f32.mrb[19].mxu1  ;;  %1052 = vmatpush1.bf16.msra.mxu1 %v889_v49  ;;  %v811_v11 = vmax.f32 %v677_v56, 0.0  ;;  %v810_v12 = vmax.f32 %v626_v59, 0.0 }
 0x13a   : > { %v825_v9 = vmax.f32 %v628_v1, 0.0  ;;  %v683_v10 = vadd.f32 %v682_v7, %v1949_v60  ;;  %v812_v15 = vmax.f32 %v679_v63, 0.0 }
 0x13b   : > { %v827_v13 = vmax.f32 %v681_v5, 0.0  ;;  %v826_v14 = vmax.f32 %v630_v6, 0.0  ;;  %1476 = vmatmul.mubr.msk.bf16.vlgmr.msra.gmra.mrb[36].mxu0 %vm916_vm1, %v1975_v2 }
 0x13c   : > { %v875_v16 = vpack.c.bf16 %v825_v9, %v809_v8  ;;  %v828_v17 = vmax.f32 %v683_v10, 0.0  ;;  %1477 = vmatmul.mubr.msk.bf16.vlgmr.msra.gmra.mrb[36].mxu1 %vm916_vm1, %v1975_v2  ;;  %1124 = vmatprep.mubr.bf16.mxu0 %v1679_v0 }
 0x13d   : > { %v877_v18 = vpack.c.bf16 %v827_v13, %v811_v11  ;;  %v876_v19 = vpack.c.bf16 %v826_v14, %v810_v12  ;;  %v633_v20 = vpop.f32.mrb[20].mxu0  ;;  %1167 = vmatprep.mubr.bf16.mxu1 %v1679_v0 }
 0x13e   : > { %v878_v21 = vpack.c.bf16 %v828_v17, %v812_v15  ;;  %v634_v22 = vadd.f32 %v633_v20, %v1947_v58  ;;  %v686_v23 = vpop.f32.mrb[20].mxu1  ;;  %v635_v24 = vpop.f32.mrb[21].mxu0 }
 0x13f   : > { %v687_v26 = vadd.f32 %v686_v23, %v1947_v58  ;;  %v636_v27 = vadd.f32 %v635_v24, %v1947_v58  ;;  %v688_v28 = vpop.f32.mrb[21].mxu1  ;;  %v637_v29 = vpop.f32.mrb[22].mxu0  ;;  %1092 = vmatprep.subr.bf16.mxu0 %v876_v19 }
 0x140   : > { %v689_v30 = vadd.f32 %v688_v28, %v1947_v58  ;;  %v638_v31 = vadd.f32 %v637_v29, %v1959_v25  ;;  %v690_v32 = vpop.f32.mrb[22].mxu1  ;;  %1135 = vmatprep.subr.bf16.mxu1 %v878_v21  ;;  %v639_v33 = vpop.f32.mrb[23].mxu0  ;;  %1093 = vmatpush1.bf16.msra.mxu0 %v875_v16  ;;  %v841_v37 = vmax.f32 %v634_v22, 0.0 }
 0x141   : > { %v691_v34 = vadd.f32 %v690_v32, %v1959_v25  ;;  %v640_v35 = vadd.f32 %v639_v33, %v1959_v25  ;;  %v692_v36 = vpop.f32.mrb[23].mxu1  ;;  %1136 = vmatpush1.bf16.msra.mxu1 %v877_v18  ;;  %v843_v40 = vmax.f32 %v687_v26, 0.0  ;;  %v842_v41 = vmax.f32 %v636_v27, 0.0 }
 0x142   : > { %v857_v38 = vmax.f32 %v638_v31, 0.0  ;;  %v693_v39 = vadd.f32 %v692_v36, %v1959_v25  ;;  %v844_v44 = vmax.f32 %v689_v30, 0.0 }
 0x143   : > { %v859_v42 = vmax.f32 %v691_v34, 0.0  ;;  %v858_v43 = vmax.f32 %v640_v35, 0.0 }
 0x144   : > { %v891_v45 = vpack.c.bf16 %v857_v38, %v841_v37  ;;  %v860_v46 = vmax.f32 %v693_v39, 0.0 }
 0x145   : > { %v893_v47 = vpack.c.bf16 %v859_v42, %v843_v40  ;;  %v892_v48 = vpack.c.bf16 %v858_v43, %v842_v41  ;;  %v729_v49 = vpop.f32.mrb[24].mxu0 }
 0x146   : > { %v894_v50 = vpack.c.bf16 %v860_v46, %v844_v44  ;;  %v730_v51 = vadd.f32 %v729_v49, %v1945_v57  ;;  %v782_v52 = vpop.f32.mrb[24].mxu1  ;;  %v731_v53 = vpop.f32.mrb[25].mxu0 }
 0x147   : > { %v783_v54 = vadd.f32 %v782_v52, %v1945_v57  ;;  %v732_v55 = vadd.f32 %v731_v53, %v1945_v57  ;;  %v784_v56 = vpop.f32.mrb[25].mxu1  ;;  %v733_v59 = vpop.f32.mrb[26].mxu0  ;;  %1094 = vmatprep.subr.bf16.mxu0 %v892_v48 }
 0x148   : > { %v785_v61 = vadd.f32 %v784_v56, %v1945_v57  ;;  %v734_v62 = vadd.f32 %v733_v59, %v1949_v60  ;;  %v786_v63 = vpop.f32.mrb[26].mxu1  ;;  %1137 = vmatprep.subr.bf16.mxu1 %v894_v50  ;;  %v735_v1 = vpop.f32.mrb[27].mxu0  ;;  %1095 = vmatpush1.bf16.msra.mxu0 %v891_v45  ;;  %v813_v6 = vmax.f32 %v730_v51, 0.0 }
 0x149   : > { %v787_v3 = vadd.f32 %v786_v63, %v1949_v60  ;;  %v736_v4 = vadd.f32 %v735_v1, %v1949_v60  ;;  %v788_v5 = vpop.f32.mrb[27].mxu1  ;;  %1138 = vmatpush1.bf16.msra.mxu1 %v893_v47  ;;  %v815_v9 = vmax.f32 %v783_v54, 0.0  ;;  %v814_v10 = vmax.f32 %v732_v55, 0.0  ;;  %v2046_v44 = vpop.permute.xlu1 %908 }
 0x14a   : > { %v829_v7 = vmax.f32 %v734_v62, 0.0  ;;  %v789_v8 = vadd.f32 %v788_v5, %v1949_v60  ;;  %v816_v12 = vmax.f32 %v785_v61, 0.0 }
 0x14b   : > { %v831_v11 = vmax.f32 %v787_v3, 0.0  ;;  %v830_v57 = vmax.f32 %v736_v4, 0.0  ;;  %1478 = vmatmul.mubr.msk.bf16.vlgmr.msra.gmra.mrb[40].mxu0 %vm916_vm1, %v1975_v2 }
 0x14c   : > { %v879_v13 = vpack.c.bf16 %v829_v7, %v813_v6  ;;  %v832_v14 = vmax.f32 %v789_v8, 0.0  ;;  %1479 = vmatmul.mubr.msk.bf16.vlgmr.msra.gmra.mrb[40].mxu1 %vm916_vm1, %v1975_v2  ;;  %1210 = vmatprep.mubr.bf16.mxu0 %v1679_v0 }
 0x14d   : > { %v881_v15 = vpack.c.bf16 %v831_v11, %v815_v9  ;;  %v880_v16 = vpack.c.bf16 %v830_v57, %v814_v10  ;;  %v739_v17 = vpop.f32.mrb[28].mxu0  ;;  %1253 = vmatprep.mubr.bf16.mxu1 %v1679_v0 }
 0x14e   : > { %v882_v60 = vpack.c.bf16 %v832_v14, %v816_v12  ;;  %v740_v18 = vadd.f32 %v739_v17, %v1947_v58  ;;  %v792_v19 = vpop.f32.mrb[28].mxu1  ;;  %v741_v20 = vpop.f32.mrb[29].mxu0 }
 0x14f   : > { %v793_v21 = vadd.f32 %v792_v19, %v1947_v58  ;;  %v742_v22 = vadd.f32 %v741_v20, %v1947_v58  ;;  %v794_v23 = vpop.f32.mrb[29].mxu1  ;;  %v743_v24 = vpop.f32.mrb[30].mxu0  ;;  %1178 = vmatprep.subr.bf16.mxu0 %v880_v16 }
 0x150   : > { %v795_v26 = vadd.f32 %v794_v23, %v1947_v58  ;;  %v744_v27 = vadd.f32 %v743_v24, %v1959_v25  ;;  %v796_v28 = vpop.f32.mrb[30].mxu1  ;;  %1221 = vmatprep.subr.bf16.mxu1 %v882_v60  ;;  %v745_v29 = vpop.f32.mrb[31].mxu0  ;;  %1179 = vmatpush1.bf16.msra.mxu0 %v879_v13  ;;  %v845_v32 = vmax.f32 %v740_v18, 0.0 }
 0x151   : > { %v797_v0 = vadd.f32 %v796_v28, %v1959_v25  ;;  %v746_v30 = vadd.f32 %v745_v29, %v1959_v25  ;;  %v798_v31 = vpop.f32.mrb[31].mxu1  ;;  %1222 = vmatpush1.bf16.msra.mxu1 %v881_v15  ;;  %v847_v35 = vmax.f32 %v793_v21, 0.0  ;;  %v846_v36 = vmax.f32 %v742_v22, 0.0 }
 0x152   : > { %v861_v33 = vmax.f32 %v744_v27, 0.0  ;;  %v799_v34 = vadd.f32 %v798_v31, %v1959_v25  ;;  %v848_v38 = vmax.f32 %v795_v26, 0.0  ;;  %v2044_v25 = vpop.permute.xlu0 %903 }
 0x153   : > { %v863_v37 = vmax.f32 %v797_v0, 0.0  ;;  %v862_v58 = vmax.f32 %v746_v30, 0.0 }
 0x154   : > { %v895_v39 = vpack.c.bf16 %v861_v33, %v845_v32  ;;  %v864_v40 = vmax.f32 %v799_v34, 0.0 }
 0x155   : > { %v897_v41 = vpack.c.bf16 %v863_v37, %v847_v35  ;;  %v896_v42 = vpack.c.bf16 %v862_v58, %v846_v36 }
 0x156   : > { %v898_v43 = vpack.c.bf16 %v864_v40, %v848_v38 }
 0x157   : > { %1180 = vmatprep.subr.bf16.mxu0 %v896_v42 }
 0x158   : > { %1223 = vmatprep.subr.bf16.mxu1 %v898_v43  ;;  %1181 = vmatpush1.bf16.msra.mxu0 %v895_v39 }
 0x159   : > { %1224 = vmatpush1.bf16.msra.mxu1 %v897_v41 }
 0x15b   : > { %1480 = vmatmul.mubr.msk.bf16.vlgmr.msra.gmra.mrb[44].mxu0 %vm916_vm1, %v1975_v2 }
 0x15c   : > { %1481 = vmatmul.mubr.msk.bf16.vlgmr.msra.gmra.mrb[44].mxu1 %vm916_vm1, %v1975_v2 }
 0x1fe   : > { %v954_v45 = vpop.f32.mrb[32].mxu0 }
 0x1ff   : > { %v955_v46 = vadd.f32 %v954_v45, %v2044_v25  ;;  %v997_v47 = vpop.f32.mrb[32].mxu1  ;;  %v956_v48 = vpop.f32.mrb[33].mxu0 }
 0x200   : > { %v998_v49 = vadd.f32 %v997_v47, %v2044_v25  ;;  %v957_v50 = vadd.f32 %v956_v48, %v2044_v25  ;;  %v999_v51 = vpop.f32.mrb[33].mxu1  ;;  %v958_v52 = vpop.f32.mrb[34].mxu0 }
 0x201   : > { %v1264_v53 = vmax.f32 %v955_v46, 0.0  ;;  %v1000_v54 = vadd.f32 %v999_v51, %v2044_v25  ;;  %v959_v2 = vadd.f32 %v958_v52, %v2046_v44  ;;  %v1001_v55 = vpop.f32.mrb[34].mxu1  ;;  %v960_v56 = vpop.f32.mrb[35].mxu0 }
 0x202   : > { %v1266_v59 = vmax.f32 %v998_v49, 0.0  ;;  %v1265_v61 = vmax.f32 %v957_v50, 0.0  ;;  %v1002_v62 = vadd.f32 %v1001_v55, %v2046_v44  ;;  %v961_v63 = vadd.f32 %v960_v56, %v2046_v44  ;;  %v1003_v1 = vpop.f32.mrb[35].mxu1 }
 0x203   : > { %1296 = vst [vmem:[%s2057_s16] sm:$0xff] %v1264_v53  ;;  %v1267_v3 = vmax.f32 %v1000_v54, 0.0  ;;  %v1280_v4 = vmax.f32 %v959_v2, 0.0  ;;  %v1004_v5 = vadd.f32 %v1003_v1, %v2046_v44 }
 0x204   : > { %1298 = vst [vmem:[%s2057_s16 + $0x10] sm:$0xff] %v1266_v59  ;;  %1297 = vst [vmem:[%s2057_s16 + $0x8] sm:$0xff] %v1265_v61  ;;  %v1282_v6 = vmax.f32 %v1002_v62, 0.0  ;;  %v1281_v7 = vmax.f32 %v961_v63, 0.0 }
 0x205   : > { %1299 = vst [vmem:[%s2057_s16 + $0x18] sm:$0xff] %v1267_v3  ;;  %1312 = vst [vmem:[%s2057_s16 + $0x80] sm:$0xff] %v1280_v4  ;;  %v1283_v8 = vmax.f32 %v1004_v5, 0.0 }
 0x206   : > { %1314 = vst [vmem:[%s2057_s16 + $0x90] sm:$0xff] %v1282_v6  ;;  %1313 = vst [vmem:[%s2057_s16 + $0x88] sm:$0xff] %v1281_v7 }
 0x207   : > { %1315 = vst [vmem:[%s2057_s16 + $0x98] sm:$0xff] %v1283_v8 }
 0x20e   : > { %v1040_v9 = vpop.f32.mrb[36].mxu0 }
 0x20f   : > { %v1041_v10 = vadd.f32 %v1040_v9, %v2044_v25  ;;  %v1083_v11 = vpop.f32.mrb[36].mxu1  ;;  %v1042_v57 = vpop.f32.mrb[37].mxu0 }
 0x210   : > { %v1084_v12 = vadd.f32 %v1083_v11, %v2044_v25  ;;  %v1043_v13 = vadd.f32 %v1042_v57, %v2044_v25  ;;  %v1085_v14 = vpop.f32.mrb[37].mxu1  ;;  %v1044_v15 = vpop.f32.mrb[38].mxu0 }
 0x211   : > { %v1268_v16 = vmax.f32 %v1041_v10, 0.0  ;;  %v1086_v17 = vadd.f32 %v1085_v14, %v2044_v25  ;;  %v1045_v60 = vadd.f32 %v1044_v15, %v2046_v44  ;;  %v1087_v18 = vpop.f32.mrb[38].mxu1  ;;  %v1046_v19 = vpop.f32.mrb[39].mxu0 }
 0x212   : > { %v1270_v20 = vmax.f32 %v1084_v12, 0.0  ;;  %v1269_v21 = vmax.f32 %v1043_v13, 0.0  ;;  %v1088_v22 = vadd.f32 %v1087_v18, %v2046_v44  ;;  %v1047_v23 = vadd.f32 %v1046_v19, %v2046_v44  ;;  %v1089_v24 = vpop.f32.mrb[39].mxu1 }
 0x213   : > { %1300 = vst [vmem:[%s2057_s16 + $0x20] sm:$0xff] %v1268_v16  ;;  %v1271_v26 = vmax.f32 %v1086_v17, 0.0  ;;  %v1284_v27 = vmax.f32 %v1045_v60, 0.0  ;;  %v1090_v28 = vadd.f32 %v1089_v24, %v2046_v44 }
 0x214   : > { %1302 = vst [vmem:[%s2057_s16 + $0x30] sm:$0xff] %v1270_v20  ;;  %1301 = vst [vmem:[%s2057_s16 + $0x28] sm:$0xff] %v1269_v21  ;;  %v1286_v29 = vmax.f32 %v1088_v22, 0.0  ;;  %v1285_v0 = vmax.f32 %v1047_v23, 0.0 }
 0x215   : > { %1303 = vst [vmem:[%s2057_s16 + $0x38] sm:$0xff] %v1271_v26  ;;  %1316 = vst [vmem:[%s2057_s16 + $0xa0] sm:$0xff] %v1284_v27  ;;  %v1287_v30 = vmax.f32 %v1090_v28, 0.0 }
 0x216   : > { %1318 = vst [vmem:[%s2057_s16 + $0xb0] sm:$0xff] %v1286_v29  ;;  %1317 = vst [vmem:[%s2057_s16 + $0xa8] sm:$0xff] %v1285_v0 }
 0x217   : > { %1319 = vst [vmem:[%s2057_s16 + $0xb8] sm:$0xff] %v1287_v30 }
 0x21e   : > { %v1126_v31 = vpop.f32.mrb[40].mxu0 }
 0x21f   : > { %v1127_v32 = vadd.f32 %v1126_v31, %v2044_v25  ;;  %v1169_v33 = vpop.f32.mrb[40].mxu1  ;;  %v1128_v34 = vpop.f32.mrb[41].mxu0 }
 0x220   : > { %v1170_v35 = vadd.f32 %v1169_v33, %v2044_v25  ;;  %v1129_v36 = vadd.f32 %v1128_v34, %v2044_v25  ;;  %v1171_v37 = vpop.f32.mrb[41].mxu1  ;;  %v1130_v58 = vpop.f32.mrb[42].mxu0 }
 0x221   : > { %v1272_v38 = vmax.f32 %v1127_v32, 0.0  ;;  %v1172_v39 = vadd.f32 %v1171_v37, %v2044_v25  ;;  %v1131_v40 = vadd.f32 %v1130_v58, %v2046_v44  ;;  %v1173_v41 = vpop.f32.mrb[42].mxu1  ;;  %v1132_v42 = vpop.f32.mrb[43].mxu0 }
 0x222   : > { %v1274_v43 = vmax.f32 %v1170_v35, 0.0  ;;  %v1273_v45 = vmax.f32 %v1129_v36, 0.0  ;;  %v1174_v46 = vadd.f32 %v1173_v41, %v2046_v44  ;;  %v1133_v47 = vadd.f32 %v1132_v42, %v2046_v44  ;;  %v1175_v48 = vpop.f32.mrb[43].mxu1 }
 0x223   : > { %1304 = vst [vmem:[%s2057_s16 + $0x40] sm:$0xff] %v1272_v38  ;;  %v1275_v49 = vmax.f32 %v1172_v39, 0.0  ;;  %v1288_v50 = vmax.f32 %v1131_v40, 0.0  ;;  %v1176_v51 = vadd.f32 %v1175_v48, %v2046_v44 }
 0x224   : > { %1306 = vst [vmem:[%s2057_s16 + $0x50] sm:$0xff] %v1274_v43  ;;  %1305 = vst [vmem:[%s2057_s16 + $0x48] sm:$0xff] %v1273_v45  ;;  %v1290_v52 = vmax.f32 %v1174_v46, 0.0  ;;  %v1289_v53 = vmax.f32 %v1133_v47, 0.0 }
 0x225   : > { %1307 = vst [vmem:[%s2057_s16 + $0x58] sm:$0xff] %v1275_v49  ;;  %1320 = vst [vmem:[%s2057_s16 + $0xc0] sm:$0xff] %v1288_v50  ;;  %v1291_v54 = vmax.f32 %v1176_v51, 0.0 }
 0x226   : > { %1322 = vst [vmem:[%s2057_s16 + $0xd0] sm:$0xff] %v1290_v52  ;;  %1321 = vst [vmem:[%s2057_s16 + $0xc8] sm:$0xff] %v1289_v53 }
 0x227   : > { %1323 = vst [vmem:[%s2057_s16 + $0xd8] sm:$0xff] %v1291_v54 }
 0x22e   : > { %v1212_v2 = vpop.f32.mrb[44].mxu0 }
 0x22f   : > { %v1213_v55 = vadd.f32 %v1212_v2, %v2044_v25  ;;  %v1255_v56 = vpop.f32.mrb[44].mxu1  ;;  %v1214_v59 = vpop.f32.mrb[45].mxu0 }
 0x230   : > { %v1256_v61 = vadd.f32 %v1255_v56, %v2044_v25  ;;  %v1215_v62 = vadd.f32 %v1214_v59, %v2044_v25  ;;  %v1257_v63 = vpop.f32.mrb[45].mxu1  ;;  %v1216_v1 = vpop.f32.mrb[46].mxu0 }
 0x231   : > { %v1276_v3 = vmax.f32 %v1213_v55, 0.0  ;;  %v1258_v4 = vadd.f32 %v1257_v63, %v2044_v25  ;;  %v1217_v5 = vadd.f32 %v1216_v1, %v2046_v44  ;;  %v1259_v6 = vpop.f32.mrb[46].mxu1  ;;  %v1218_v7 = vpop.f32.mrb[47].mxu0 }
 0x232   : > { %v1278_v8 = vmax.f32 %v1256_v61, 0.0  ;;  %v1277_v9 = vmax.f32 %v1215_v62, 0.0  ;;  %v1260_v10 = vadd.f32 %v1259_v6, %v2046_v44  ;;  %v1219_v11 = vadd.f32 %v1218_v7, %v2046_v44  ;;  %v1261_v57 = vpop.f32.mrb[47].mxu1 }
 0x233   : > { %1308 = vst [vmem:[%s2057_s16 + $0x60] sm:$0xff] %v1276_v3  ;;  %v1279_v25 = vmax.f32 %v1258_v4, 0.0  ;;  %v1292_v12 = vmax.f32 %v1217_v5, 0.0  ;;  %v1262_v13 = vadd.f32 %v1261_v57, %v2046_v44 }
 0x234   : > { %1310 = vst [vmem:[%s2057_s16 + $0x70] sm:$0xff] %v1278_v8  ;;  %1309 = vst [vmem:[%s2057_s16 + $0x68] sm:$0xff] %v1277_v9  ;;  %v1294_v14 = vmax.f32 %v1260_v10, 0.0  ;;  %v1293_v15 = vmax.f32 %v1219_v11, 0.0 }
 0x235   : > { %1311 = vst [vmem:[%s2057_s16 + $0x78] sm:$0xff] %v1279_v25  ;;  %1324 = vst [vmem:[%s2057_s16 + $0xe0] sm:$0xff] %v1292_v12  ;;  %v1295_v16 = vmax.f32 %v1262_v13, 0.0 }
 0x236   : > { %1326 = vst [vmem:[%s2057_s16 + $0xf0] sm:$0xff] %v1294_v14  ;;  %1325 = vst [vmem:[%s2057_s16 + $0xe8] sm:$0xff] %v1293_v15 }
 0x237   : > { %1327 = vst [vmem:[%s2057_s16 + $0xf8] sm:$0xff] %v1295_v16 }
 0x238   : > { %1605 = shalt.err (!%p1602_p4)
}
 0x239   : > { %s1606_s10 = scalar_lea.hbm %s2116_s9, 4096  ;;  %s1610_s14 = scalar_lea.hbm %s2177_s5, 8192 }
 0x23a   : > { %p1607_p7 = scmp.ne.s32.totalorder %s2116_s9, %s1606_s10  ;;  %p1611_p1 = scmp.lt.u32.totalorder %s2116_s9, %s2177_s5 }
 0x23b   : > { %p1612_p3 = scmp.lt.u32.totalorder %s1610_s14, %s1606_s10  ;;  %p1614_p9 = scmp.lt.u32.totalorder %s1606_s10, %s2116_s9 }
 0x23c   : > { %p1608_p10 = pnand %p1607_p7, %p2185_p11 }
 0x23d   : > { %p1613_p8 = por %p1612_p3, %p1611_p1 }
 0x23e   : > { %p1609_p12 = pneg %p1608_p10 }
 0x23f   : > { %p1615_p0 = por %p1614_p9, %p1613_p8 }
 0x241   : > { %p1616_p6 = pnand %p1615_p0, %p1609_p12 }
 0x243   : > { %1619 = shalt.err (!%p1616_p6)
}
 0x244   : > { %s1681_s21 = smov 2048   ;;  %s1682_s24 = smov 128  }
 0x245   : > { %1492 = dma.vmem_to_hbm [thread:$0]  (%p2185_p11), %s2118_s17, 4096, %s2116_s9, %s1329_s12, %s1681_s21, %s1681_s21, %s1682_s24  }
 0x246 PF: > { %s1359_s13 = sand.u32 1, %s1654_s18   ;;  %p2186_p13 = scmp.ne.s32.totalorder %s2182_s8, 0 }
 0x247   : > { %p2187_p2 = scmp.ge.s32.totalorder %s1674_s23, 2  ;;  %s1360_s15 = scalar_lea.sflag [#allocation4], %s1359_s13 }
 0x249   : > { %p1499_p5 = pnand %p2187_p2, %p2186_p13 }
 0x24b   : > { %1649 = dma.done.wait (!%p1499_p5), %s1360_s15, 4096  }
 0x24c   : > { %1651 = vsyncadd (!%p1499_p5), %s1360_s15, 4294963200  ;;  %s21_s23 = sadd.s32 1, %s1674_s23   ;;  %s2188_s18 = smov %s1658_s19 }
 0x24d   : > { %p18_p4 = scmp.ge.s32.totalorder %s21_s23, 4   ;;  %s2189_s19 = smov %s1662_s20 }
 0x24e   : > { %s2190_s20 = smov %s1769_s7  ;;  %s2191_s21 = smov %s1670_s22 }
 0x24f   : > { %s2192_s22 = smov %s2194_s26  ;;  %20 = sbr.rel (!%p18_p4) target bundleno = 6 (0x6), region = 88 }
 0x256   :  { %1365 = vsyncpa [#allocation3], 1 }
 0x257   :  { %1367 = vsyncpa [#allocation3 + $0x1], 1 }
 0x258   :  { %1368 = vsyncpa [#allocation4], 1 }
 0x259   :  { %1370 = vsyncpa [#allocation4 + $0x1], 1 }

</bundles_post_ra>
